<compile_context>
chip_gen: v6e
topology: v6e:2x2x1
jax: 0.10.0
libtpu: 0.0.40
codegen_flags: <defaults>
</compile_context>

<pallas_src>
import jax
import jax.numpy as jnp
from jax.experimental import pallas as pl
from jax.experimental.pallas import tpu as pltpu


def _critic_kernel(state_ref, embed_ref, action_ref,
                   w1_ref, w2_ref, w3_ref, b_ref, out_ref):
    F = state_ref.shape[1]
    A = action_ref.shape[1]

    # Single load of the packed bias slab; rows 0/1/2 are the three fused
    # (lane-padded) bias vectors.  Hoisted so each is broadcast exactly once.
    biases = b_ref[...]                      # (8, 128)
    b1 = biases[0:1, :]
    b2 = biases[1:2, :]
    b3 = biases[2:3, :]

    # ---- Layer 1 (both heads fused along the 128-lane output axis) --------
    # The PyTorch concat([state, sa_embed, action], 1) is folded in as three
    # partial matmuls against 8-row-aligned row-blocks of the fused weight.
    h = jnp.dot(state_ref[...], w1_ref[0:F, :],
                preferred_element_type=jnp.float32)
    h = h + jnp.dot(embed_ref[...], w1_ref[F:2 * F, :],
                    preferred_element_type=jnp.float32)
    h = h + jnp.dot(action_ref[...], w1_ref[2 * F:2 * F + A, :],
                    preferred_element_type=jnp.float32)
    h = jnp.maximum(h + b1, 0.0)

    # ---- Layer 2 (block-diagonal fused weights: head1 cols 0:H, head2 H:2H)
    h = jnp.dot(h, w2_ref[...], preferred_element_type=jnp.float32)
    h = jnp.maximum(h + b2, 0.0)

    # ---- Layer 3 (fused: lane 0 = q1, lane 1 = q2, remaining lanes zero) ---
    q = jnp.dot(h, w3_ref[...], preferred_element_type=jnp.float32) + b3
    out_ref[...] = q.astype(out_ref.dtype)


def latent_critic_forward(state, sa_embed, action, packed):
    """Pallas implementation of LatentCritic.forward (linear_approx=False).

    state:    [B, feature_dim]
    sa_embed: [B, feature_dim]
    action:   [B, action_dim]
    packed:   dict from pack_params() (fused, lane-padded weights/biases).
    Returns (q1, q2), each [B, 1] float32.
    """
    B = state.shape[0]
    W = packed["w1"].shape[1]                # lane-padded fused width (>= 128)

    # Tile the batch only when it is large; weights stay resident across steps.
    TB = B if B <= 512 else 512
    grid = (pl.cdiv(B, TB),)

    def batch_spec(a):
        return pl.BlockSpec((TB, a.shape[1]), lambda i: (i, 0),
                            memory_space=pltpu.VMEM)

    def resident(a):
        return pl.BlockSpec(a.shape, lambda i: (0,) * a.ndim,
                            memory_space=pltpu.VMEM)

    out = pl.pallas_call(
        _critic_kernel,
        out_shape=jax.ShapeDtypeStruct((B, W), jnp.float32),
        grid=grid,
        in_specs=[batch_spec(state), batch_spec(sa_embed), batch_spec(action),
                  resident(packed["w1"]), resident(packed["w2"]),
                  resident(packed["w3"]), resident(packed["b"])],
        out_specs=pl.BlockSpec((TB, W), lambda i: (i, 0),
                               memory_space=pltpu.VMEM),
        compiler_params=pltpu.CompilerParams(
            dimension_semantics=("parallel",)),
    )(state.astype(jnp.float32), sa_embed.astype(jnp.float32),
      action.astype(jnp.float32),
      packed["w1"], packed["w2"], packed["w3"], packed["b"])

    return out[:, 0:1], out[:, 1:2]


def init_params(key, feature_dim, action_dim, hidden_dim):
    """Deterministic synthetic parameters (PyTorch Linear shapes, stored transposed:
    weights [in, out], biases [1, out])."""
    in_dim = feature_dim * 2 + action_dim
    dims = [(in_dim, hidden_dim), (hidden_dim, hidden_dim), (hidden_dim, 1)]
    names = ["1", "2", "3"]
    params = {}
    for head in ("a", "b"):
        for (din, dout), n in zip(dims, names):
            key, kw, kb = jax.random.split(key, 3)
            scale = 1.0 / jnp.sqrt(jnp.float32(din))
            params[f"w{n}{head}"] = (jax.random.normal(kw, (din, dout), jnp.float32)
                                     * scale)
            params[f"b{n}{head}"] = (jax.random.normal(kb, (1, dout), jnp.float32)
                                     * 0.01)
    return params


def pack_params(params, feature_dim, action_dim, hidden_dim):
    """One-time packing: fuse both heads and zero-pad to a 128-lane width."""
    in_dim = feature_dim * 2 + action_dim
    H = hidden_dim
    W = ((2 * H + 127) // 128) * 128         # lane-padded fused hidden width

    w1 = jnp.zeros((in_dim, W), jnp.float32)
    w1 = w1.at[:, :H].set(params["w1a"]).at[:, H:2 * H].set(params["w1b"])

    w2 = jnp.zeros((W, W), jnp.float32)      # block-diagonal
    w2 = w2.at[:H, :H].set(params["w2a"]).at[H:2 * H, H:2 * H].set(params["w2b"])

    w3 = jnp.zeros((W, W), jnp.float32)      # lane 0 = q1, lane 1 = q2
    w3 = w3.at[:H, 0:1].set(params["w3a"]).at[H:2 * H, 1:2].set(params["w3b"])

    b = jnp.zeros((8, W), jnp.float32)       # one DMA for all six biases
    b = b.at[0, :H].set(params["b1a"][0]).at[0, H:2 * H].set(params["b1b"][0])
    b = b.at[1, :H].set(params["b2a"][0]).at[1, H:2 * H].set(params["b2b"][0])
    b = b.at[2, 0].set(params["b3a"][0, 0]).at[2, 1].set(params["b3b"][0, 0])

    return {"w1": w1, "w2": w2, "w3": w3, "b": b}


def _reference_forward(state, sa_embed, action, params):
    """Pure-JAX reference on the ORIGINAL (unfused) parameters."""
    sa = jnp.concatenate([state, sa_embed, action], axis=1).astype(jnp.float32)

    def head(h, s):
        h = jnp.maximum(h @ params[f"w1{s}"] + params[f"b1{s}"], 0.0)
        h = jnp.maximum(h @ params[f"w2{s}"] + params[f"b2{s}"], 0.0)
        return h @ params[f"w3{s}"] + params[f"b3{s}"]

    return head(sa, "a"), head(sa, "b")


if __name__ == "__main__":
    feature_dim, action_dim, hidden_dim = 16, 8, 32
    batch = 8

    key = jax.random.PRNGKey(0)
    key, ks, ke, ka = jax.random.split(key, 4)
    state = jax.random.normal(ks, (batch, feature_dim), jnp.float32)
    sa_embed = jax.random.normal(ke, (batch, feature_dim), jnp.float32)
    action = jax.random.normal(ka, (batch, action_dim), jnp.float32)

    params = init_params(key, feature_dim, action_dim, hidden_dim)
    packed = pack_params(params, feature_dim, action_dim, hidden_dim)

    q1, q2 = latent_critic_forward(state, sa_embed, action, packed)
    q1 = jax.block_until_ready(q1)
    q2 = jax.block_until_ready(q2)

    # Correctness check: fused/padded kernel vs. unfused pure-JAX reference.
    r1, r2 = _reference_forward(state, sa_embed, action, params)
    assert q1.shape == (batch, 1) and q2.shape == (batch, 1)
    assert jnp.allclose(q1, r1, atol=1e-5, rtol=1e-5)
    assert jnp.allclose(q2, r2, atol=1e-5, rtol=1e-5)

    print("KERNEL_OK")
</pallas_src>

<mosaic_0001>
module attributes {stable_mosaic.version = 11 : i64} {
  func.func @_critic_kernel(%arg0: i32, %arg1: memref<8x16xf32, #tpu.memory_space<vmem>>, %arg2: memref<8x16xf32, #tpu.memory_space<vmem>>, %arg3: memref<8x8xf32, #tpu.memory_space<vmem>>, %arg4: memref<40x128xf32, #tpu.memory_space<vmem>>, %arg5: memref<128x128xf32, #tpu.memory_space<vmem>>, %arg6: memref<128x128xf32, #tpu.memory_space<vmem>>, %arg7: memref<8x128xf32, #tpu.memory_space<vmem>>, %arg8: memref<8x128xf32, #tpu.memory_space<vmem>>) attributes {dimension_semantics = [#tpu.dimension_semantics<parallel>], iteration_bounds = array<i64: 1>, scalar_prefetch = 0 : i64, scratch_operands = 0 : i64, tpu.core_type = #tpu.core_type<tc>, window_params = [{transform_indices = @transform_0, window_bounds = array<i64: 8, 16>}, {transform_indices = @transform_1, window_bounds = array<i64: 8, 16>}, {transform_indices = @transform_2, window_bounds = array<i64: 8, 8>}, {pipeline_mode = #tpu.pipeline_mode<synchronous>, transform_indices = @transform_3, window_bounds = array<i64: 40, 128>}, {pipeline_mode = #tpu.pipeline_mode<synchronous>, transform_indices = @transform_4, window_bounds = array<i64: 128, 128>}, {pipeline_mode = #tpu.pipeline_mode<synchronous>, transform_indices = @transform_5, window_bounds = array<i64: 128, 128>}, {pipeline_mode = #tpu.pipeline_mode<synchronous>, transform_indices = @transform_6, window_bounds = array<i64: 8, 128>}, {transform_indices = @transform_7, window_bounds = array<i64: 8, 128>}]} {
    %c0 = arith.constant 0 : index
    %c0_0 = arith.constant 0 : index
    %0 = vector.load %arg7[%c0, %c0_0] : memref<8x128xf32, #tpu.memory_space<vmem>>, vector<8x128xf32>
    %1 = vector.extract_strided_slice %0 {offsets = [0, 0], sizes = [1, 128], strides = [1, 1]} : vector<8x128xf32> to vector<1x128xf32>
    %2 = vector.extract_strided_slice %0 {offsets = [1, 0], sizes = [1, 128], strides = [1, 1]} : vector<8x128xf32> to vector<1x128xf32>
    %3 = vector.extract_strided_slice %0 {offsets = [2, 0], sizes = [1, 128], strides = [1, 1]} : vector<8x128xf32> to vector<1x128xf32>
    %c0_1 = arith.constant 0 : index
    %c0_2 = arith.constant 0 : index
    %4 = vector.load %arg1[%c0_1, %c0_2] : memref<8x16xf32, #tpu.memory_space<vmem>>, vector<8x16xf32>
    %c0_3 = arith.constant 0 : index
    %c0_4 = arith.constant 0 : index
    %5 = vector.load %arg4[%c0_3, %c0_4] : memref<40x128xf32, #tpu.memory_space<vmem>>, vector<16x128xf32>
    %cst = arith.constant dense<0.000000e+00> : vector<8x128xf32>
    %6 = tpu.matmul %4, %5, %cst {dimension_numbers = #tpu.dot_dimension_numbers<[1], [0], [0], [1], [0, 0, 1, 1], [], []>} : vector<8x16xf32>, vector<16x128xf32>, vector<8x128xf32> -> vector<8x128xf32>
    %c0_5 = arith.constant 0 : index
    %c0_6 = arith.constant 0 : index
    %7 = vector.load %arg2[%c0_5, %c0_6] : memref<8x16xf32, #tpu.memory_space<vmem>>, vector<8x16xf32>
    %c16 = arith.constant 16 : index
    %c0_7 = arith.constant 0 : index
    %8 = vector.load %arg4[%c16, %c0_7] : memref<40x128xf32, #tpu.memory_space<vmem>>, vector<16x128xf32>
    %cst_8 = arith.constant dense<0.000000e+00> : vector<8x128xf32>
    %9 = tpu.matmul %7, %8, %cst_8 {dimension_numbers = #tpu.dot_dimension_numbers<[1], [0], [0], [1], [0, 0, 1, 1], [], []>} : vector<8x16xf32>, vector<16x128xf32>, vector<8x128xf32> -> vector<8x128xf32>
    %10 = arith.addf %6, %9 : vector<8x128xf32>
    %c0_9 = arith.constant 0 : index
    %c0_10 = arith.constant 0 : index
    %11 = vector.load %arg3[%c0_9, %c0_10] : memref<8x8xf32, #tpu.memory_space<vmem>>, vector<8x8xf32>
    %c32 = arith.constant 32 : index
    %c0_11 = arith.constant 0 : index
    %12 = vector.load %arg4[%c32, %c0_11] : memref<40x128xf32, #tpu.memory_space<vmem>>, vector<8x128xf32>
    %cst_12 = arith.constant dense<0.000000e+00> : vector<8x128xf32>
    %13 = tpu.matmul %11, %12, %cst_12 {dimension_numbers = #tpu.dot_dimension_numbers<[1], [0], [0], [1], [0, 0, 1, 1], [], []>} : vector<8x8xf32>, vector<8x128xf32>, vector<8x128xf32> -> vector<8x128xf32>
    %14 = arith.addf %10, %13 : vector<8x128xf32>
    %15 = vector.broadcast %1 : vector<1x128xf32> to vector<8x128xf32>
    %16 = arith.addf %14, %15 : vector<8x128xf32>
    %cst_13 = arith.constant 0.000000e+00 : f32
    %17 = vector.broadcast %cst_13 : f32 to vector<8x128xf32>
    %18 = arith.maximumf %16, %17 : vector<8x128xf32>
    %c0_14 = arith.constant 0 : index
    %c0_15 = arith.constant 0 : index
    %19 = vector.load %arg5[%c0_14, %c0_15] : memref<128x128xf32, #tpu.memory_space<vmem>>, vector<128x128xf32>
    %cst_16 = arith.constant dense<0.000000e+00> : vector<8x128xf32>
    %20 = tpu.matmul %18, %19, %cst_16 {dimension_numbers = #tpu.dot_dimension_numbers<[1], [0], [0], [1], [0, 0, 1, 1], [], []>} : vector<8x128xf32>, vector<128x128xf32>, vector<8x128xf32> -> vector<8x128xf32>
    %21 = vector.broadcast %2 : vector<1x128xf32> to vector<8x128xf32>
    %22 = arith.addf %20, %21 : vector<8x128xf32>
    %cst_17 = arith.constant 0.000000e+00 : f32
    %23 = vector.broadcast %cst_17 : f32 to vector<8x128xf32>
    %24 = arith.maximumf %22, %23 : vector<8x128xf32>
    %c0_18 = arith.constant 0 : index
    %c0_19 = arith.constant 0 : index
    %25 = vector.load %arg6[%c0_18, %c0_19] : memref<128x128xf32, #tpu.memory_space<vmem>>, vector<128x128xf32>
    %cst_20 = arith.constant dense<0.000000e+00> : vector<8x128xf32>
    %26 = tpu.matmul %24, %25, %cst_20 {dimension_numbers = #tpu.dot_dimension_numbers<[1], [0], [0], [1], [0, 0, 1, 1], [], []>} : vector<8x128xf32>, vector<128x128xf32>, vector<8x128xf32> -> vector<8x128xf32>
    %27 = vector.broadcast %3 : vector<1x128xf32> to vector<8x128xf32>
    %28 = arith.addf %26, %27 : vector<8x128xf32>
    %c0_21 = arith.constant 0 : index
    %c0_22 = arith.constant 0 : index
    %29 = vector.load %arg8[%c0_21, %c0_22] : memref<8x128xf32, #tpu.memory_space<vmem>>, vector<8x128xf32>
    tpu.vector_store %arg8[%c0_21, %c0_22], %28 {strides = array<i32>} : memref<8x128xf32, #tpu.memory_space<vmem>>, vector<8x128xf32>,
    return
  }
  func.func @transform_0(%arg0: i32) -> (i32, i32) {
    %c0_i32 = arith.constant 0 : i32
    %c0_i32_0 = arith.constant 0 : i32
    return %arg0, %c0_i32 : i32, i32
  }
  func.func @transform_1(%arg0: i32) -> (i32, i32) {
    %c0_i32 = arith.constant 0 : i32
    %c0_i32_0 = arith.constant 0 : i32
    return %arg0, %c0_i32 : i32, i32
  }
  func.func @transform_2(%arg0: i32) -> (i32, i32) {
    %c0_i32 = arith.constant 0 : i32
    %c0_i32_0 = arith.constant 0 : i32
    return %arg0, %c0_i32 : i32, i32
  }
  func.func @transform_3(%arg0: i32) -> (i32, i32) {
    %c0_i32 = arith.constant 0 : i32
    %c0_i32_0 = arith.constant 0 : i32
    %c0_i32_1 = arith.constant 0 : i32
    return %c0_i32, %c0_i32_0 : i32, i32
  }
  func.func @transform_4(%arg0: i32) -> (i32, i32) {
    %c0_i32 = arith.constant 0 : i32
    %c0_i32_0 = arith.constant 0 : i32
    %c0_i32_1 = arith.constant 0 : i32
    return %c0_i32, %c0_i32_0 : i32, i32
  }
  func.func @transform_5(%arg0: i32) -> (i32, i32) {
    %c0_i32 = arith.constant 0 : i32
    %c0_i32_0 = arith.constant 0 : i32
    %c0_i32_1 = arith.constant 0 : i32
    return %c0_i32, %c0_i32_0 : i32, i32
  }
  func.func @transform_6(%arg0: i32) -> (i32, i32) {
    %c0_i32 = arith.constant 0 : i32
    %c0_i32_0 = arith.constant 0 : i32
    %c0_i32_1 = arith.constant 0 : i32
    return %c0_i32, %c0_i32_0 : i32, i32
  }
  func.func @transform_7(%arg0: i32) -> (i32, i32) {
    %c0_i32 = arith.constant 0 : i32
    %c0_i32_0 = arith.constant 0 : i32
    return %arg0, %c0_i32 : i32, i32
  }
}

</mosaic_0001>

<bundles_post_ra>
// kernel: tpu_custom_call.1
= control target key start
LH: loop header
LB: loop body
LE: loop exit
PB: predicated region body
PF: predicated region fallthrough
CT: control target
= control target key end

     0   :  { %12 = vsyncpa [#allocation3], 0  ;;  %s966_s0 = inlined_call_operand.hbm [shape: f32[8,16], index: 0, kind: input, shape index: {}]   ;;  %s967_s1 = inlined_call_operand.hbm [shape: f32[8,16], index: 1, kind: input, shape index: {}]   ;;  %s968_s2 = inlined_call_operand.hbm [shape: f32[8,8], index: 2, kind: input, shape index: {}]   ;;  %s969_s3 = inlined_call_operand.hbm [shape: f32[40,128], index: 3, kind: input, shape index: {}]   ;;  %s970_s4 = inlined_call_operand.hbm [shape: f32[128,128], index: 4, kind: input, shape index: {}]   ;;  %s971_s5 = inlined_call_operand.hbm [shape: f32[128,128], index: 5, kind: input, shape index: {}]   ;;  %s972_s6 = inlined_call_operand.vmem [shape: f32[8,128], index: 6, kind: input, shape index: {}]   ;;  %s973_s7 = inlined_call_operand.hbm [shape: f32[8,128], index: 7, kind: output, shape index: {}]  }
   0x1   :  { %13 = vsyncpa [#allocation6], 0 }
   0x2   :  { %14 = vsyncpa [#allocation9], 0 }
   0x3   :  { %15 = vsyncpa [#allocation12], 0 }
   0x4   :  { %16 = vsyncpa [#allocation4], 0  ;;  %s835_s24 = smov [#allocation5]   ;;  %s836_s26 = smov [#allocation8]  }
   0x5   :  { %s33_s25 = sshll.u32 %s835_s24, 4  ;;  %s52_s27 = sshll.u32 %s836_s26, 4  ;;  %s34_s25 = int_to_ptr.vmem [resolvable:$true] %s33_s25  ;;  %s53_s27 = int_to_ptr.vmem [resolvable:$true] %s52_s27 }
   0x6   :  { %s693_s28 = scalar_lea.vmem %s34_s25, 128  ;;  %p698_p1 = scmp.lt.s32.totalorder %s34_s25, %s34_s25 }
   0x7   :  { %p694_p0 = scmp.ne.s32.totalorder %s34_s25, %s693_s28  ;;  %p699_p2 = scmp.lt.s32.totalorder %s693_s28, %s693_s28 }
   0x9   :  { %p700_p3 = por %p699_p2, %p698_p1 }
   0xb   :  { %p701_p4 = pnand %p700_p3, %p694_p0 }
   0xd   :  { %704 = shalt.err (!%p701_p4)
}
   0xe   :  { %36 = dma.hbm_to_vmem [thread:$0]  %s967_s1, 128, %s34_s25, [#allocation6]  }
   0xf   :  { %s713_s8 = scalar_lea.vmem %s53_s27, 640  ;;  %p718_p6 = scmp.lt.s32.totalorder %s53_s27, %s53_s27 }
  0x10   :  { %p714_p5 = scmp.ne.s32.totalorder %s53_s27, %s713_s8  ;;  %p719_p7 = scmp.lt.s32.totalorder %s713_s8, %s713_s8 }
  0x12   :  { %p720_p8 = por %p719_p7, %p718_p6 }
  0x14   :  { %p721_p9 = pnand %p720_p8, %p714_p5 }
  0x16   :  { %724 = shalt.err (!%p721_p9)
}
  0x17   :  { %s837_s9 = smov 128   ;;  %s838_s10 = smov 8  }
  0x18   :  { %58 = dma.hbm_to_vmem [thread:$0]  %s969_s3, 640, %s53_s27, [#allocation9], %s837_s9, %s837_s9, %s838_s10  }
  0x19   :  { %s839_s13 = smov [#allocation2]   ;;  %s840_s15 = smov [#allocation7]  }
  0x1a   :  { %s23_s14 = sshll.u32 %s839_s13, 4  ;;  %s43_s1 = sshll.u32 %s840_s15, 4  ;;  %s24_s14 = int_to_ptr.vmem [resolvable:$true] %s23_s14  ;;  %s44_s1 = int_to_ptr.vmem [resolvable:$true] %s43_s1 }
  0x1b   :  { %s733_s16 = scalar_lea.vmem %s24_s14, 128  ;;  %p738_p11 = scmp.lt.s32.totalorder %s24_s14, %s24_s14 }
  0x1c   :  { %p734_p10 = scmp.ne.s32.totalorder %s24_s14, %s733_s16  ;;  %p739_p12 = scmp.lt.s32.totalorder %s733_s16, %s733_s16 }
  0x1e   :  { %p740_p13 = por %p739_p12, %p738_p11 }
  0x20   :  { %p741_p0 = pnand %p740_p13, %p734_p10 }
  0x22   :  { %744 = shalt.err (!%p741_p0)
}
  0x23   :  { %26 = dma.hbm_to_vmem [thread:$0]  %s966_s0, 128, %s24_s14, [#allocation3]  }
  0x24   :  { %s753_s19 = scalar_lea.vmem %s44_s1, 128  ;;  %p758_p2 = scmp.lt.s32.totalorder %s44_s1, %s44_s1 }
  0x25   :  { %p754_p1 = scmp.ne.s32.totalorder %s44_s1, %s753_s19  ;;  %p759_p3 = scmp.lt.s32.totalorder %s753_s19, %s753_s19 }
  0x27   :  { %p760_p4 = por %p759_p3, %p758_p2 }
  0x29   :  { %p761_p5 = pnand %p760_p4, %p754_p1 }
  0x2b   :  { %764 = shalt.err (!%p761_p5)
}
  0x2c   :  { %46 = dma.hbm_to_vmem [thread:$0]  %s968_s2, 128, %s44_s1, [#allocation6]  }
  0x2d   :  { %s841_s21 = smov [#allocation10]   ;;  %s842_s23 = smov [#allocation11]  }
  0x2e   :  { %s64_s22 = sshll.u32 %s841_s21, 4  ;;  %s76_s24 = sshll.u32 %s842_s23, 4  ;;  %s65_s22 = int_to_ptr.vmem [resolvable:$true] %s64_s22  ;;  %s77_s24 = int_to_ptr.vmem [resolvable:$true] %s76_s24 }
  0x2f   :  { %s773_s25 = scalar_lea.vmem %s65_s22, 2048  ;;  %p778_p7 = scmp.lt.s32.totalorder %s65_s22, %s65_s22 }
  0x30   :  { %p774_p6 = scmp.ne.s32.totalorder %s65_s22, %s773_s25  ;;  %p779_p8 = scmp.lt.s32.totalorder %s773_s25, %s773_s25 }
  0x32   :  { %p780_p9 = por %p779_p8, %p778_p7 }
  0x34   :  { %p781_p10 = pnand %p780_p9, %p774_p6 }
  0x36   :  { %784 = shalt.err (!%p781_p10)
}
  0x37   :  { %70 = dma.hbm_to_vmem [thread:$0]  %s970_s4, 2048, %s65_s22, [#allocation9], %s837_s9, %s837_s9, %s838_s10  }
  0x38   :  { %s793_s2 = scalar_lea.vmem %s77_s24, 2048  ;;  %p798_p12 = scmp.lt.s32.totalorder %s77_s24, %s77_s24 }
  0x39   :  { %p794_p11 = scmp.ne.s32.totalorder %s77_s24, %s793_s2  ;;  %p799_p13 = scmp.lt.s32.totalorder %s793_s2, %s793_s2 }
  0x3b   :  { %p800_p0 = por %p799_p13, %p798_p12 }
  0x3d   :  { %p801_p1 = pnand %p800_p0, %p794_p11 }
  0x3f   :  { %804 = shalt.err (!%p801_p1)
}
  0x40   :  { %82 = dma.hbm_to_vmem [thread:$0]  %s971_s5, 2048, %s77_s24, [#allocation12], %s837_s9, %s837_s9, %s838_s10  }
  0x41   :  { %825 = dma.done.wait [#allocation3], 128  }
  0x42   :  { %826 = vsyncadd [#allocation3], 4294967168 }
  0x43   :  { %827 = dma.done.wait [#allocation6], 256  }
  0x44   :  { %828 = vsyncadd [#allocation6], 4294967040 }
  0x45   :  { %829 = dma.done.wait [#allocation9], 2688  }
  0x46   :  { %830 = vsyncadd [#allocation9], 4294964608 }
  0x47   :  { %831 = dma.done.wait [#allocation12], 2048  }
  0x48   :  { %832 = vsyncadd [#allocation12], 4294965248  ;;  %v843_v0 = vmov 0.0   ;;  %vm844_vm0 = vmmov 0   ;;  %v109_v1 = vld [vmem:[#allocation8 + $0x18] sm:$0xff]  ;;  %v106_v2 = vld [vmem:[#allocation8 + $0x8] sm:$0xff]  ;;  %v334_v38 = vlaneseq }
  0x49   :  { %585 = vmatprep.subr.mxu0 %v843_v0  ;;  %592 = vmatprep.subr.mxu1 %v843_v0  ;;  %v108_v3 = vld [vmem:[#allocation8 + $0x10] sm:$0xff]  ;;  %vm110_vm1 = vcmask 130048   ;;  %v105_v5 = vld [vmem:[#allocation8] sm:$0xff]  ;;  %v104_v6 = vld [vmem:[#allocation2] sm:$0xff]  ;;  %vm259_vm2 = vcmask 64512  }
  0x4a   :  { %589 = vmatprep.mubr.msk.f32.mxu0 %vm844_vm0, %v843_v0  ;;  %596 = vmatprep.mubr.msk.f32.mxu1 %vm844_vm0, %v843_v0  ;;  %v107_v4 = vld [vmem:[#allocation5] sm:$0xff]  ;;  %v258_v7 = vld [vmem:[#allocation8 + $0x20] sm:$0xff]  ;;  %v257_v9 = vld [vmem:[#allocation7] sm:$0xff]  ;;  %v335_v39 = vshrl.u32 %v334_v38, 7 }
  0x4b   :  { %586 = vmatpush3.msra.mxu0 %v109_v1  ;;  %593 = vmatpush3.msra.mxu1 %v106_v2  ;;  %v355_v8 = vld [vmem:[#allocation10 + $0x78] sm:$0xff]  ;;  %v354_v10 = vld [vmem:[#allocation10 + $0x70] sm:$0xff]  ;;  %v353_v11 = vld [vmem:[#allocation10 + $0x68] sm:$0xff] }
  0x4c   :  { %587 = vmatprep.subr.mxu0 %v843_v0  ;;  %594 = vmatprep.subr.mxu1 %v843_v0  ;;  %v352_v12 = vld [vmem:[#allocation10 + $0x60] sm:$0xff]  ;;  %v351_v13 = vld [vmem:[#allocation10 + $0x58] sm:$0xff]  ;;  %v350_v14 = vld [vmem:[#allocation10 + $0x50] sm:$0xff]  ;;  %v336_v40 = vsub.s32 0, %v335_v39  ;;  %v358_v56 = vsub.s32 1, %v335_v39  ;;  %v449_v62 = vsub.s32 2, %v335_v39 }
  0x4d   :  { %588 = vmatpush3.msra.mxu0 %v108_v3  ;;  %595 = vmatpush3.msra.mxu1 %v105_v5  ;;  %v349_v15 = vld [vmem:[#allocation10 + $0x48] sm:$0xff]  ;;  %v348_v16 = vld [vmem:[#allocation10 + $0x40] sm:$0xff]  ;;  %v347_v17 = vld [vmem:[#allocation10 + $0x38] sm:$0xff] }
  0x4e   :  { %590 = vmatmul.mubr.msk.f32.vlgmr.msra.gmra.mxu0 %vm110_vm1, %v107_v4  ;;  %599 = vmatprep.subr.mxu0 %v843_v0  ;;  %v346_v18 = vld [vmem:[#allocation10 + $0x30] sm:$0xff]  ;;  %v345_v19 = vld [vmem:[#allocation10 + $0x28] sm:$0xff]  ;;  %v344_v20 = vld [vmem:[#allocation10 + $0x20] sm:$0xff] }
  0x4f   :  { %597 = vmatmul.mubr.msk.f32.vlgmr.msra.gmra.mxu1 %vm110_vm1, %v104_v6  ;;  %600 = vmatpush3.msra.mxu0 %v258_v7  ;;  %v343_v21 = vld [vmem:[#allocation10 + $0x18] sm:$0xff]  ;;  %v342_v22 = vld [vmem:[#allocation10 + $0x10] sm:$0xff]  ;;  %v341_v23 = vld [vmem:[#allocation10 + $0x8] sm:$0xff] }
  0x50   :  { %601 = vmatprep.mubr.msk.f32.mxu0 %vm844_vm0, %v843_v0  ;;  %604 = vmatprep.subr.mxu1 %v843_v0  ;;  %v340_v24 = vld [vmem:[#allocation10] sm:$0xff]  ;;  %v446_v25 = vld [vmem:[#allocation11 + $0x78] sm:$0xff]  ;;  %v445_v26 = vld [vmem:[#allocation11 + $0x70] sm:$0xff] }
  0x51   :  { %605 = vmatpush3.msra.mxu1 %v355_v8  ;;  %636 = vmatprep.mubr.msk.f32.mxu1 %vm844_vm0, %v843_v0  ;;  %v444_v27 = vld [vmem:[#allocation11 + $0x68] sm:$0xff]  ;;  %v443_v28 = vld [vmem:[#allocation11 + $0x60] sm:$0xff]  ;;  %v442_v29 = vld [vmem:[#allocation11 + $0x58] sm:$0xff] }
  0x52   :  { %602 = vmatmul.mubr.msk.f32.vlgmr.msra.gmra.mxu0 %vm259_vm2, %v257_v9  ;;  %606 = vmatprep.subr.mxu1 %v843_v0  ;;  %v441_v30 = vld [vmem:[#allocation11 + $0x50] sm:$0xff]  ;;  %v440_v31 = vld [vmem:[#allocation11 + $0x48] sm:$0xff]  ;;  %v439_v32 = vld [vmem:[#allocation11 + $0x40] sm:$0xff] }
  0x53   :  { %607 = vmatpush3.msra.mxu1 %v354_v10  ;;  %639 = vmatprep.subr.mxu0 %v843_v0  ;;  %v438_v33 = vld [vmem:[#allocation11 + $0x38] sm:$0xff]  ;;  %v437_v34 = vld [vmem:[#allocation11 + $0x30] sm:$0xff]  ;;  %v436_v35 = vld [vmem:[#allocation11 + $0x28] sm:$0xff] }
  0x54   :  { %608 = vmatprep.subr.mxu1 %v843_v0  ;;  %671 = vmatprep.mubr.msk.f32.mxu0 %vm844_vm0, %v843_v0  ;;  %v435_v36 = vld [vmem:[#allocation11 + $0x20] sm:$0xff]  ;;  %v434_v37 = vld [vmem:[#allocation11 + $0x18] sm:$0xff]  ;;  %v433_v53 = vld [vmem:[#allocation11 + $0x10] sm:$0xff] }
  0x55   :  { %609 = vmatpush3.msra.mxu1 %v353_v11  ;;  %640 = vmatpush3.msra.mxu0 %v446_v25  ;;  %v103_v42 = vld [vmem:[%s972_s6] sm:$0xff]  ;;  %v432_v54 = vld [vmem:[#allocation11 + $0x8] sm:$0xff]  ;;  %s845_s6 = smov [#allocation13]  }
  0x56   :  { %610 = vmatprep.subr.mxu1 %v843_v0  ;;  %641 = vmatprep.subr.mxu0 %v843_v0  ;;  %v337_v47 = vrot.slane %v103_v42, %v336_v40  ;;  %v431_v55 = vld [vmem:[#allocation11] sm:$0xff]  ;;  %v359_v57 = vrot.slane %v103_v42, %v358_v56  ;;  %v450_v63 = vrot.slane %v103_v42, %v449_v62  ;;  %s528_s29 = sshll.u32 %s845_s6, 4  ;;  %s529_s29 = int_to_ptr.vmem [resolvable:$true] %s528_s29 }
  0x57   :  { %611 = vmatpush3.msra.mxu1 %v352_v12  ;;  %642 = vmatpush3.msra.mxu0 %v445_v26  ;;  %s805_s30 = scalar_lea.vmem %s529_s29, 128  ;;  %p810_p3 = scmp.lt.s32.totalorder %s529_s29, %s529_s29 }
  0x58   :  { %612 = vmatprep.subr.mxu1 %v843_v0  ;;  %643 = vmatprep.subr.mxu0 %v843_v0  ;;  %p806_p2 = scmp.ne.s32.totalorder %s529_s29, %s805_s30  ;;  %p811_p4 = scmp.lt.s32.totalorder %s805_s30, %s805_s30 }
  0x59   :  { %613 = vmatpush3.msra.mxu1 %v351_v13  ;;  %644 = vmatpush3.msra.mxu0 %v444_v27 }
  0x5a   :  { %614 = vmatprep.subr.mxu1 %v843_v0  ;;  %645 = vmatprep.subr.mxu0 %v843_v0  ;;  %p812_p5 = por %p811_p4, %p810_p3 }
  0x5b   :  { %615 = vmatpush3.msra.mxu1 %v350_v14  ;;  %646 = vmatpush3.msra.mxu0 %v443_v28 }
  0x5c   :  { %616 = vmatprep.subr.mxu1 %v843_v0  ;;  %647 = vmatprep.subr.mxu0 %v843_v0  ;;  %p813_p6 = pnand %p812_p5, %p806_p2 }
  0x5d   :  { %617 = vmatpush3.msra.mxu1 %v349_v15  ;;  %648 = vmatpush3.msra.mxu0 %v442_v29 }
  0x5e   :  { %618 = vmatprep.subr.mxu1 %v843_v0  ;;  %649 = vmatprep.subr.mxu0 %v843_v0 }
  0x5f   :  { %619 = vmatpush3.msra.mxu1 %v348_v16  ;;  %650 = vmatpush3.msra.mxu0 %v441_v30 }
  0x60   :  { %620 = vmatprep.subr.mxu1 %v843_v0  ;;  %651 = vmatprep.subr.mxu0 %v843_v0 }
  0x61   :  { %621 = vmatpush3.msra.mxu1 %v347_v17  ;;  %652 = vmatpush3.msra.mxu0 %v440_v31 }
  0x62   :  { %622 = vmatprep.subr.mxu1 %v843_v0  ;;  %653 = vmatprep.subr.mxu0 %v843_v0 }
  0x63   :  { %623 = vmatpush3.msra.mxu1 %v346_v18  ;;  %654 = vmatpush3.msra.mxu0 %v439_v32 }
  0x64   :  { %624 = vmatprep.subr.mxu1 %v843_v0  ;;  %655 = vmatprep.subr.mxu0 %v843_v0 }
  0x65   :  { %625 = vmatpush3.msra.mxu1 %v345_v19  ;;  %656 = vmatpush3.msra.mxu0 %v438_v33 }
  0x66   :  { %626 = vmatprep.subr.mxu1 %v843_v0  ;;  %657 = vmatprep.subr.mxu0 %v843_v0 }
  0x67   :  { %627 = vmatpush3.msra.mxu1 %v344_v20  ;;  %658 = vmatpush3.msra.mxu0 %v437_v34 }
  0x68   :  { %628 = vmatprep.subr.mxu1 %v843_v0  ;;  %659 = vmatprep.subr.mxu0 %v843_v0 }
  0x69   :  { %629 = vmatpush3.msra.mxu1 %v343_v21  ;;  %660 = vmatpush3.msra.mxu0 %v436_v35 }
  0x6a   :  { %630 = vmatprep.subr.mxu1 %v843_v0  ;;  %661 = vmatprep.subr.mxu0 %v843_v0 }
  0x6b   :  { %631 = vmatpush3.msra.mxu1 %v342_v22  ;;  %662 = vmatpush3.msra.mxu0 %v435_v36 }
  0x6c   :  { %632 = vmatprep.subr.mxu1 %v843_v0  ;;  %663 = vmatprep.subr.mxu0 %v843_v0 }
  0x6d   :  { %633 = vmatpush3.msra.mxu1 %v341_v23  ;;  %664 = vmatpush3.msra.mxu0 %v434_v37 }
  0x6e   :  { %634 = vmatprep.subr.mxu1 %v843_v0  ;;  %665 = vmatprep.subr.mxu0 %v843_v0 }
  0x6f   :  { %635 = vmatpush3.msra.mxu1 %v340_v24  ;;  %666 = vmatpush3.msra.mxu0 %v433_v53 }
  0x70   :  { %667 = vmatprep.subr.mxu0 %v843_v0 }
  0x71   :  { %668 = vmatpush3.msra.mxu0 %v432_v54 }
  0x72   :  { %669 = vmatprep.subr.mxu0 %v843_v0 }
  0x73   :  { %670 = vmatpush3.msra.mxu0 %v431_v55 }
 0x10e   :  { %v180_v41 = vpop.f32.mrf.mxu0 }
 0x10f   :  { %v253_v43 = vpop.f32.mrf.mxu1 }
 0x110   :  { %v591_v44 = vpop.f32.mrf.mxu0  ;;  %v254_v45 = vadd.f32 %v253_v43, %v180_v41 }
 0x111   :  { %v598_v46 = vpop.f32.mrf.mxu1 }
 0x112   :  { %v329_v48 = vpop.f32.mrf.mxu0 }
 0x113   :  { %v333_v49 = vadd.f32 %v329_v48, %v254_v45 }
 0x114   :  { %v603_v50 = vpop.f32.mrf.mxu0 }
 0x115   :  { %v338_v51 = vadd.f32 %v337_v47, %v333_v49 }
 0x117   :  { %v339_v52 = vmax.f32 %v338_v51, 0.0 }
 0x119   :  { %637 = vmatmul.mubr.f32.vlgmr.msra.gmra.mxu1 %v339_v52 }
 0x1d9   :  { %v426_v58 = vpop.f32.mrf.mxu1 }
 0x1da   :  { %v427_v59 = vadd.f32 %v426_v58, %v359_v57 }
 0x1db   :  { %v638_v60 = vpop.f32.mrf.mxu1 }
 0x1dc   :  { %v430_v61 = vmax.f32 %v427_v59, 0.0 }
 0x1de   :  { %672 = vmatmul.mubr.f32.vlgmr.msra.gmra.mxu0 %v430_v61 }
 0x29e   :  { %v517_v1 = vpop.f32.mrf.mxu0 }
 0x29f   :  { %v518_v2 = vadd.f32 %v517_v1, %v450_v63 }
 0x2a0   :  { %v673_v3 = vpop.f32.mrf.mxu0 }
 0x2a1   :  { %521 = vst [vmem:[#allocation13] sm:$0xff] %v518_v2 }
 0x2a2   :  { %816 = shalt.err (!%p813_p6)
}
 0x2a3   :  { %531 = dma.vmem_to_hbm [thread:$0]  %s529_s29, 128, %s973_s7, [#allocation4]  }
 0x2a4   :  { %833 = dma.done.wait [#allocation4], 128  }
 0x2a5   :  { %834 = vsyncadd [#allocation4], 4294967168 }
 0x2a6   :  { %535 = vsyncpa [#allocation3], 1 }
 0x2a7   :  { %536 = vsyncpa [#allocation6], 1 }
 0x2a8   :  { %537 = vsyncpa [#allocation9], 1 }
 0x2a9   :  { %538 = vsyncpa [#allocation12], 1 }
 0x2aa   :  { %539 = vsyncpa [#allocation4], 1 }

</bundles_post_ra>
